<compile_context>
chip_gen: v5e
topology: v5e:2x2
jax: 0.10.0
libtpu: 0.0.40
codegen_flags: <defaults>
</compile_context>

<pallas_src>
import jax
import jax.numpy as jnp
from jax.experimental import pallas as pl
from jax.experimental.pallas import tpu as pltpu


LANE = 128                         # lane width / feature-dim padding target
ROW_TILE = 512                     # A_hat row tile (sublane axis), tiled path
K_TILE = 2048                      # A_hat reduction tile (lane axis), tiled path
FUSED_MAX_NODES = 4096             # bf16 A_hat resident <= 32 MiB -> fused path
XW_RESIDENT_MAX_BYTES = 24 << 20   # keep XW VMEM-resident below this size
VMEM_LIMIT = 48 << 20              # fits v7x 64 MiB; fine on v5e/v6e (128 MiB)


def _round_up(x, m):
    return ((x + m - 1) // m) * m


def _pad_to(arr, shape):
    pads = [(0, s - d) for d, s in zip(arr.shape, shape)]
    return jnp.pad(arr, pads)


def _masked_log_softmax(z, num_valid_cols):
    """log_softmax over the first num_valid_cols lanes; the rest is zero pad."""
    mask = jax.lax.broadcasted_iota(jnp.int32, z.shape, 1) < num_valid_cols
    m = jnp.max(jnp.where(mask, z, -jnp.inf), axis=1, keepdims=True)
    s = z - m
    e = jnp.where(mask, jnp.exp(s), 0.0)
    lse = jnp.log(jnp.sum(e, axis=1, keepdims=True))
    return s - lse


# ---------------------------------------------------------------------------
# Tiled (large-graph) A-pass: out = act(A_hat @ XW + b), XW precomputed.
# ---------------------------------------------------------------------------
def make_gcn_aggregate_kernel(apply_relu, num_valid_cols, tk, xw_resident):
    def kernel(a_ref, xw_ref, b_ref, out_ref, acc_ref):
        k = pl.program_id(1)

        @pl.when(k == 0)
        def _init():
            acc_ref[...] = jnp.zeros_like(acc_ref)

        if xw_resident:
            # XW lives in VMEM for the whole grid; slice the K-chunk here.
            off = pl.multiple_of(k * tk, tk)
            xw = xw_ref[pl.ds(off, tk), :]
        else:
            xw = xw_ref[...]
        # (tm, tk) @ (tk, o_pad) on the MXU, f32 accumulation into scratch.
        acc_ref[...] += jnp.dot(a_ref[...], xw,
                                preferred_element_type=jnp.float32)

        @pl.when(k == pl.num_programs(1) - 1)
        def _epilogue():
            z = acc_ref[...] + b_ref[...]           # bias added once per row tile
            if apply_relu:
                out_ref[...] = jnp.maximum(z, 0.0).astype(out_ref.dtype)
            else:
                out_ref[...] = _masked_log_softmax(
                    z, num_valid_cols).astype(out_ref.dtype)

    return kernel


def gcn_aggregate(a_bf16, xw_bf16, b_f32, *, apply_relu, num_valid_cols,
                  out_dtype, tm, tk):
    n_pad = a_bf16.shape[0]
    o_pad = xw_bf16.shape[1]
    assert a_bf16.shape == (n_pad, n_pad)
    assert xw_bf16.shape[0] == n_pad
    assert n_pad % tm == 0 and n_pad % tk == 0, (n_pad, tm, tk)
    grid = (n_pad // tm, n_pad // tk)

    xw_resident = xw_bf16.size * xw_bf16.dtype.itemsize <= XW_RESIDENT_MAX_BYTES
    if xw_resident:
        # Constant block index -> DMA'd once, resident for the whole grid.
        xw_spec = pl.BlockSpec((n_pad, o_pad), lambda i, k: (0, 0))
    else:
        # Very large graphs: fall back to streaming the K-slice of XW.
        xw_spec = pl.BlockSpec((tk, o_pad), lambda i, k: (k, 0))

    kernel = make_gcn_aggregate_kernel(apply_relu, num_valid_cols, tk,
                                       xw_resident)

    return pl.pallas_call(
        kernel,
        out_shape=jax.ShapeDtypeStruct((n_pad, o_pad), out_dtype),
        grid_spec=pltpu.PrefetchScalarGridSpec(
            num_scalar_prefetch=0,
            grid=grid,
            in_specs=[
                pl.BlockSpec((tm, tk), lambda i, k: (i, k)),    # A_hat tile
                xw_spec,                                        # precomputed XW
                pl.BlockSpec((1, o_pad), lambda i, k: (0, 0)),  # bias
            ],
            out_specs=pl.BlockSpec((tm, o_pad), lambda i, k: (i, 0)),
            scratch_shapes=[pltpu.VMEM((tm, o_pad), jnp.float32)],
        ),
        compiler_params=pltpu.CompilerParams(
            dimension_semantics=("parallel", "arbitrary"),
            vmem_limit_bytes=VMEM_LIMIT,
        ),
    )(a_bf16, xw_bf16, b_f32)


# ---------------------------------------------------------------------------
# Fused (small-graph) path: both layers in one pallas_call, A_hat read once.
# ---------------------------------------------------------------------------
def make_fused_kernel(num_classes):
    def kernel(a_ref, xw1_ref, b1_ref, w2_ref, b2_ref, out_ref):
        a = a_ref[...]
        # Layer 1: H = relu(A @ (X W1) + b1); padded hidden lanes stay zero.
        h = jnp.dot(a, xw1_ref[...], preferred_element_type=jnp.float32)
        h = jnp.maximum(h + b1_ref[...], 0.0)
        # Layer 2: Z = A @ (H W2) + b2.
        hw2 = jnp.dot(h.astype(jnp.bfloat16), w2_ref[...],
                      preferred_element_type=jnp.float32)
        z = jnp.dot(a, hw2.astype(jnp.bfloat16),
                    preferred_element_type=jnp.float32) + b2_ref[...]
        out_ref[...] = _masked_log_softmax(z, num_classes).astype(out_ref.dtype)

    return kernel


def gnn1_fused(a_bf16, xw1_bf16, b1_f32, w2_bf16, b2_f32, *, num_classes):
    n_pad = a_bf16.shape[0]
    h_pad = xw1_bf16.shape[1]
    c_pad = w2_bf16.shape[1]
    return pl.pallas_call(
        make_fused_kernel(num_classes),
        out_shape=jax.ShapeDtypeStruct((n_pad, c_pad), jnp.float32),
        grid_spec=pltpu.PrefetchScalarGridSpec(
            num_scalar_prefetch=0,
            grid=(1,),
            in_specs=[
                pl.BlockSpec((n_pad, n_pad), lambda i: (0, 0)),  # A_hat resident
                pl.BlockSpec((n_pad, h_pad), lambda i: (0, 0)),  # XW1
                pl.BlockSpec((1, h_pad), lambda i: (0, 0)),      # b1
                pl.BlockSpec((h_pad, c_pad), lambda i: (0, 0)),  # W2
                pl.BlockSpec((1, c_pad), lambda i: (0, 0)),      # b2
            ],
            out_specs=pl.BlockSpec((n_pad, c_pad), lambda i: (0, 0)),
        ),
        compiler_params=pltpu.CompilerParams(
            dimension_semantics=("arbitrary",),
            vmem_limit_bytes=VMEM_LIMIT,
        ),
    )(a_bf16, xw1_bf16, b1_f32, w2_bf16, b2_f32)


# ---------------------------------------------------------------------------
# Full forward.
# ---------------------------------------------------------------------------
def gnn1_forward(a_hat, x, w1, b1, w2, b2, *, force_tiled=False):
    """GNN1 forward. Returns log-probabilities [N, num_classes] (f32)."""
    n = x.shape[0]
    hidden = w1.shape[1]
    n_classes = w2.shape[1]

    h_pad = _round_up(hidden, LANE)
    c_pad = _round_up(n_classes, LANE)

    b1_p = _pad_to(jnp.reshape(b1, (1, -1)), (1, h_pad)).astype(jnp.float32)
    b2_p = _pad_to(jnp.reshape(b2, (1, -1)), (1, c_pad)).astype(jnp.float32)
    w2_p = _pad_to(w2, (h_pad, c_pad)).astype(jnp.bfloat16)

    # Feature matmul hoisted out of the A-pass: XW1 = X @ W1 computed once.
    xw1 = jnp.dot(x, w1, preferred_element_type=jnp.float32)

    if (n <= FUSED_MAX_NODES) and not force_tiled:
        # Small-graph path: one pallas_call, A_hat streamed from HBM once.
        n_pad = _round_up(n, LANE)
        a_p = _pad_to(a_hat, (n_pad, n_pad)).astype(jnp.bfloat16)
        xw1_p = _pad_to(xw1, (n_pad, h_pad)).astype(jnp.bfloat16)
        out_pad = gnn1_fused(a_p, xw1_p, b1_p, w2_p, b2_p,
                             num_classes=n_classes)
        return out_pad[:n, :n_classes]

    # Large-graph path: one tiled A-pass per layer.
    tm = ROW_TILE
    n_pad = _round_up(n, tm)                      # pad only to the row tile
    # Clamp K tile to a divisor of n_pad (n_pad is a multiple of ROW_TILE=512).
    tk = max(t for t in (K_TILE, K_TILE // 2, K_TILE // 4) if n_pad % t == 0)

    a_p = _pad_to(a_hat, (n_pad, n_pad)).astype(jnp.bfloat16)
    xw1_p = _pad_to(xw1, (n_pad, h_pad)).astype(jnp.bfloat16)

    # Layer 1: H = relu(A_hat @ XW1 + b1) -> bf16, feeds layer 2.
    h = gcn_aggregate(a_p, xw1_p, b1_p, apply_relu=True,
                      num_valid_cols=hidden, out_dtype=jnp.bfloat16,
                      tm=tm, tk=tk)
    # Layer-2 feature matmul, also hoisted out of the A-pass (tiny XLA matmul).
    xw2 = jnp.dot(h, w2_p, preferred_element_type=jnp.float32).astype(jnp.bfloat16)
    # Layer 2: log_softmax(A_hat @ XW2 + b2) -> f32 lane-dense slab.
    out_pad = gcn_aggregate(a_p, xw2, b2_p, apply_relu=False,
                            num_valid_cols=n_classes, out_dtype=jnp.float32,
                            tm=tm, tk=tk)
    return out_pad[:n, :n_classes]


def build_normalized_adjacency(edge_index, num_nodes):
    """Dense GCN normalization: A_hat = D^{-1/2} (A + I) D^{-1/2}."""
    src, dst = edge_index[0], edge_index[1]
    adj = jnp.zeros((num_nodes, num_nodes), jnp.float32)
    # Duplicate edges accumulate (GCNConv sums messages over repeated edges).
    adj = adj.at[dst, src].add(1.0)
    diag = jnp.arange(num_nodes)
    # add_remaining_self_loops: ensure every node has a self loop of weight >= 1.
    # TODO(synk): exact PyG parity for pre-existing weighted self loops.
    adj = adj.at[diag, diag].max(1.0)
    deg = jnp.sum(adj, axis=1)
    d_inv_sqrt = jnp.where(deg > 0, 1.0 / jnp.sqrt(deg), 0.0)
    return d_inv_sqrt[:, None] * adj * d_inv_sqrt[None, :]


if __name__ == "__main__":
    key = jax.random.PRNGKey(0)
    k_x, k_e, k_w1, k_w2 = jax.random.split(key, 4)

    # Small synthetic graph: N nodes, E directed edges.
    num_nodes = 16
    num_edges = 32
    input_dim = 8
    hidden_dim = 16
    output_dim = 4

    x = jax.random.normal(k_x, (num_nodes, input_dim), jnp.float32)
    edge_index = jax.random.randint(k_e, (2, num_edges), 0, num_nodes)

    # GCNConv-shaped parameters: W1 [Fin, 16], W2 [16, Fout], zero biases.
    w1 = jax.random.normal(k_w1, (input_dim, hidden_dim), jnp.float32) * (
        1.0 / jnp.sqrt(input_dim))
    b1 = jnp.zeros((hidden_dim,), jnp.float32)
    w2 = jax.random.normal(k_w2, (hidden_dim, output_dim), jnp.float32) * (
        1.0 / jnp.sqrt(hidden_dim))
    b2 = jnp.zeros((output_dim,), jnp.float32)

    a_hat = build_normalized_adjacency(edge_index, num_nodes)

    # Pure-JAX f32 reference of the same math (kernels use bf16 operands with
    # f32 accumulation, hence the modest tolerance).
    h_ref = jnp.maximum(a_hat @ (x @ w1) + b1[None, :], 0.0)
    z_ref = a_hat @ (h_ref @ w2) + b2[None, :]
    ref = jax.nn.log_softmax(z_ref, axis=1)

    # 1) Small-graph fused path (A_hat read from HBM once for both layers).
    out_fused = jax.block_until_ready(gnn1_forward(a_hat, x, w1, b1, w2, b2))
    assert out_fused.shape == ref.shape, "fused path shape mismatch"
    assert jnp.allclose(out_fused, ref, atol=5e-2), "fused path mismatch vs ref"

    # 2) Tiled large-graph path, exercised at small N to keep it validated.
    out_tiled = jax.block_until_ready(
        gnn1_forward(a_hat, x, w1, b1, w2, b2, force_tiled=True))
    assert out_tiled.shape == ref.shape, "tiled path shape mismatch"
    assert jnp.allclose(out_tiled, ref, atol=5e-2), "tiled path mismatch vs ref"

    print("KERNEL_OK")
</pallas_src>

<mosaic_0001>
module attributes {stable_mosaic.version = 11 : i64} {
  func.func @kernel(%arg0: i32, %arg1: memref<128x128xbf16, #tpu.memory_space<vmem>>, %arg2: memref<128x128xbf16, #tpu.memory_space<vmem>>, %arg3: memref<1x128xf32, #tpu.memory_space<vmem>>, %arg4: memref<128x128xbf16, #tpu.memory_space<vmem>>, %arg5: memref<1x128xf32, #tpu.memory_space<vmem>>, %arg6: memref<128x128xf32, #tpu.memory_space<vmem>>) attributes {dimension_semantics = [#tpu.dimension_semantics<arbitrary>], iteration_bounds = array<i64: 1>, scalar_prefetch = 0 : i64, scratch_operands = 0 : i64, tpu.core_type = #tpu.core_type<tc>, window_params = [{pipeline_mode = #tpu.pipeline_mode<synchronous>, transform_indices = @transform_0, window_bounds = array<i64: 128, 128>}, {pipeline_mode = #tpu.pipeline_mode<synchronous>, transform_indices = @transform_1, window_bounds = array<i64: 128, 128>}, {pipeline_mode = #tpu.pipeline_mode<synchronous>, transform_indices = @transform_2, window_bounds = array<i64: 1, 128>}, {pipeline_mode = #tpu.pipeline_mode<synchronous>, transform_indices = @transform_3, window_bounds = array<i64: 128, 128>}, {pipeline_mode = #tpu.pipeline_mode<synchronous>, transform_indices = @transform_4, window_bounds = array<i64: 1, 128>}, {pipeline_mode = #tpu.pipeline_mode<synchronous>, transform_indices = @transform_5, window_bounds = array<i64: 128, 128>}]} {
    %c0 = arith.constant 0 : index
    %c0_0 = arith.constant 0 : index
    %0 = vector.load %arg1[%c0, %c0_0] : memref<128x128xbf16, #tpu.memory_space<vmem>>, vector<128x128xbf16>
    %c0_1 = arith.constant 0 : index
    %c0_2 = arith.constant 0 : index
    %1 = vector.load %arg2[%c0_1, %c0_2] : memref<128x128xbf16, #tpu.memory_space<vmem>>, vector<128x128xbf16>
    %cst = arith.constant dense<0.000000e+00> : vector<128x128xf32>
    %2 = tpu.matmul %0, %1, %cst {dimension_numbers = #tpu.dot_dimension_numbers<[1], [0], [0], [1], [0, 0, 1, 1], [], []>} : vector<128x128xbf16>, vector<128x128xbf16>, vector<128x128xf32> -> vector<128x128xf32>
    %c0_3 = arith.constant 0 : index
    %c0_4 = arith.constant 0 : index
    %3 = vector.load %arg3[%c0_3, %c0_4] : memref<1x128xf32, #tpu.memory_space<vmem>>, vector<1x128xf32>
    %4 = vector.broadcast %3 : vector<1x128xf32> to vector<128x128xf32>
    %5 = arith.addf %2, %4 : vector<128x128xf32>
    %cst_5 = arith.constant 0.000000e+00 : f32
    %6 = vector.broadcast %cst_5 : f32 to vector<128x128xf32>
    %7 = arith.maximumf %5, %6 : vector<128x128xf32>
    %8 = arith.truncf %7 : vector<128x128xf32> to vector<128x128xbf16>
    %c0_6 = arith.constant 0 : index
    %c0_7 = arith.constant 0 : index
    %9 = vector.load %arg4[%c0_6, %c0_7] : memref<128x128xbf16, #tpu.memory_space<vmem>>, vector<128x128xbf16>
    %cst_8 = arith.constant dense<0.000000e+00> : vector<128x128xf32>
    %10 = tpu.matmul %8, %9, %cst_8 {dimension_numbers = #tpu.dot_dimension_numbers<[1], [0], [0], [1], [0, 0, 1, 1], [], []>} : vector<128x128xbf16>, vector<128x128xbf16>, vector<128x128xf32> -> vector<128x128xf32>
    %11 = arith.truncf %10 : vector<128x128xf32> to vector<128x128xbf16>
    %cst_9 = arith.constant dense<0.000000e+00> : vector<128x128xf32>
    %12 = tpu.matmul %0, %11, %cst_9 {dimension_numbers = #tpu.dot_dimension_numbers<[1], [0], [0], [1], [0, 0, 1, 1], [], []>} : vector<128x128xbf16>, vector<128x128xbf16>, vector<128x128xf32> -> vector<128x128xf32>
    %c0_10 = arith.constant 0 : index
    %c0_11 = arith.constant 0 : index
    %13 = vector.load %arg5[%c0_10, %c0_11] : memref<1x128xf32, #tpu.memory_space<vmem>>, vector<1x128xf32>
    %14 = vector.broadcast %13 : vector<1x128xf32> to vector<128x128xf32>
    %15 = arith.addf %12, %14 : vector<128x128xf32>
    %16 = tpu.iota {dimensions = array<i32: 1>} : vector<128x128xi32>
    %c4_i32 = arith.constant 4 : i32
    %17 = vector.broadcast %c4_i32 : i32 to vector<128x128xi32>
    %18 = arith.cmpi slt, %16, %17 : vector<128x128xi32>
    %cst_12 = arith.constant 0xFF800000 : f32
    %19 = vector.broadcast %cst_12 : f32 to vector<128x128xf32>
    %20 = arith.select %18, %15, %19 : vector<128x128xi1>, vector<128x128xf32>
    %cst_13 = arith.constant dense<0xFF800000> : vector<128xf32>
    %21 = vector.multi_reduction <maximumf>, %20, %cst_13 [1] : vector<128x128xf32> to vector<128xf32>
    %22 = vector.shape_cast %21 : vector<128xf32> to vector<128x1xf32>
    %23 = vector.broadcast %22 : vector<128x1xf32> to vector<128x128xf32>
    %24 = arith.subf %15, %23 : vector<128x128xf32>
    %25 = math.exp %24 : vector<128x128xf32>
    %cst_14 = arith.constant 0.000000e+00 : f32
    %26 = vector.broadcast %cst_14 : f32 to vector<128x128xf32>
    %27 = arith.select %18, %25, %26 : vector<128x128xi1>, vector<128x128xf32>
    %cst_15 = arith.constant dense<0.000000e+00> : vector<128xf32>
    %28 = vector.multi_reduction <add>, %27, %cst_15 [1] : vector<128x128xf32> to vector<128xf32>
    %29 = vector.shape_cast %28 : vector<128xf32> to vector<128x1xf32>
    %30 = math.log %29 : vector<128x1xf32>
    %31 = vector.broadcast %30 : vector<128x1xf32> to vector<128x128xf32>
    %32 = arith.subf %24, %31 : vector<128x128xf32>
    %c0_16 = arith.constant 0 : index
    %c0_17 = arith.constant 0 : index
    %33 = vector.load %arg6[%c0_16, %c0_17] : memref<128x128xf32, #tpu.memory_space<vmem>>, vector<128x128xf32>
    tpu.vector_store %arg6[%c0_16, %c0_17], %32 {strides = array<i32>} : memref<128x128xf32, #tpu.memory_space<vmem>>, vector<128x128xf32>,
    return
  }
  func.func @transform_0(%arg0: i32) -> (i32, i32) {
    %c0_i32 = arith.constant 0 : i32
    %c0_i32_0 = arith.constant 0 : i32
    %c0_i32_1 = arith.constant 0 : i32
    return %c0_i32, %c0_i32_0 : i32, i32
  }
  func.func @transform_1(%arg0: i32) -> (i32, i32) {
    %c0_i32 = arith.constant 0 : i32
    %c0_i32_0 = arith.constant 0 : i32
    %c0_i32_1 = arith.constant 0 : i32
    return %c0_i32, %c0_i32_0 : i32, i32
  }
  func.func @transform_2(%arg0: i32) -> (i32, i32) {
    %c0_i32 = arith.constant 0 : i32
    %c0_i32_0 = arith.constant 0 : i32
    %c0_i32_1 = arith.constant 0 : i32
    return %c0_i32, %c0_i32_0 : i32, i32
  }
  func.func @transform_3(%arg0: i32) -> (i32, i32) {
    %c0_i32 = arith.constant 0 : i32
    %c0_i32_0 = arith.constant 0 : i32
    %c0_i32_1 = arith.constant 0 : i32
    return %c0_i32, %c0_i32_0 : i32, i32
  }
  func.func @transform_4(%arg0: i32) -> (i32, i32) {
    %c0_i32 = arith.constant 0 : i32
    %c0_i32_0 = arith.constant 0 : i32
    %c0_i32_1 = arith.constant 0 : i32
    return %c0_i32, %c0_i32_0 : i32, i32
  }
  func.func @transform_5(%arg0: i32) -> (i32, i32) {
    %c0_i32 = arith.constant 0 : i32
    %c0_i32_0 = arith.constant 0 : i32
    %c0_i32_1 = arith.constant 0 : i32
    return %c0_i32, %c0_i32_0 : i32, i32
  }
}

</mosaic_0001>

<bundles_post_ra>
// kernel: tpu_custom_call.1
= control target key start
LH: loop header
LB: loop body
LE: loop exit
PB: predicated region body
PF: predicated region fallthrough
CT: control target
= control target key end

     0   :  { %10 = vsyncpa [#allocation3], 0  ;;  %s1299_s0 = inlined_call_operand.hbm [shape: bf16[128,128], index: 0, kind: input, shape index: {}]   ;;  %s1300_s1 = inlined_call_operand.hbm [shape: bf16[128,128], index: 1, kind: input, shape index: {}]   ;;  %s1301_s2 = inlined_call_operand.vmem [shape: f32[1,128], index: 2, kind: input, shape index: {}]   ;;  %s1302_s3 = inlined_call_operand.hbm [shape: bf16[128,128], index: 3, kind: input, shape index: {}]   ;;  %s1303_s4 = inlined_call_operand.vmem [shape: f32[1,128], index: 4, kind: input, shape index: {}]   ;;  %s1304_s5 = inlined_call_operand.hbm [shape: f32[128,128], index: 5, kind: output, shape index: {}]  }
   0x1   :  { %11 = vsyncpa [#allocation6], 0 }
   0x2   :  { %12 = vsyncpa [#allocation4], 0  ;;  %s30_s20 = sshll.u32 %s1300_s1, 4  ;;  %s998_s21 = smov [#allocation5]   ;;  %s31_s20 = int_to_ptr.hbm [resolvable:$true] %s30_s20 }
   0x3   :  { %s32_s22 = sshll.u32 %s998_s21, 4  ;;  %s17_s25 = sshll.u32 %s1299_s0, 4  ;;  %s33_s22 = int_to_ptr.vmem [resolvable:$true] %s32_s22  ;;  %s18_s25 = int_to_ptr.hbm [resolvable:$true] %s17_s25 }
   0x4   :  { %s999_s26 = smov 64   ;;  %s1000_s27 = smov 4  }
   0x5   :  { %38 = dma.hbm_to_vmem [thread:$0]  %s31_s20, 1024, %s33_s22, [#allocation6], %s999_s26, %s999_s26, %s1000_s27  }
   0x6   :  { %s1001_s28 = smov [#allocation2]   ;;  %s45_s7 = sshll.u32 %s1302_s3, 4  ;;  %s46_s7 = int_to_ptr.hbm [resolvable:$true] %s45_s7 }
   0x7   :  { %s19_s29 = sshll.u32 %s1001_s28, 4  ;;  %s1002_s1 = smov [#allocation7]   ;;  %s20_s29 = int_to_ptr.vmem [resolvable:$true] %s19_s29 }
   0x8   :  { %25 = dma.hbm_to_vmem [thread:$0]  %s18_s25, 1024, %s20_s29, [#allocation3], %s999_s26, %s999_s26, %s1000_s27  }
   0x9   :  { %s47_s8 = sshll.u32 %s1002_s1, 4  ;;  %s48_s8 = int_to_ptr.vmem [resolvable:$true] %s47_s8 }
   0xa   :  { %53 = dma.hbm_to_vmem [thread:$0]  %s46_s7, 1024, %s48_s8, [#allocation6], %s999_s26, %s999_s26, %s1000_s27  }
   0xb   :  { %992 = dma.done.wait [#allocation3], 1024  }
   0xc   :  { %993 = vsyncadd [#allocation3], 4294966272 }
   0xd   :  { %994 = dma.done.wait [#allocation6], 2048  }
   0xe   :  { %995 = vsyncadd [#allocation6], 4294965248  ;;  %v789_v0 = vld [vmem:[#allocation5 + $0x38] sm:$0xff]  ;;  %v788_v1 = vld [vmem:[#allocation5 + $0x30] sm:$0xff]  ;;  %s664_s13 = sshll.u32 %s1304_s5, 4  ;;  %s1004_s14 = smov 128   ;;  %s665_s13 = int_to_ptr.hbm [resolvable:$true] %s664_s13 }
   0xf   :  { %200 = vmatpush.bf16.msra.mxu0 %v789_v0  ;;  %798 = vmatpush.bf16.msra.mxu3 %v789_v0  ;;  %v787_v2 = vld [vmem:[#allocation5 + $0x28] sm:$0xff]  ;;  %v786_v3 = vld [vmem:[#allocation5 + $0x20] sm:$0xff]  ;;  %v785_v4 = vld [vmem:[#allocation5 + $0x18] sm:$0xff]  ;;  %s1005_s15 = smov 8  }
  0x10   :  { %v784_v5 = vld [vmem:[#allocation5 + $0x10] sm:$0xff]  ;;  %v783_v6 = vld [vmem:[#allocation5 + $0x8] sm:$0xff]  ;;  %v782_v7 = vld [vmem:[#allocation5] sm:$0xff] }
  0x11   :  { %v1045_v8 = vld [vmem:[#allocation2] sm:$0xff]  ;;  %v1047_v9 = vld [vmem:[#allocation2 + $0x30] sm:$0xff]  ;;  %v1051_v10 = vld [vmem:[#allocation2 + $0x8] sm:$0xff] }
  0x12   :  { %v1053_v11 = vld [vmem:[#allocation2 + $0x38] sm:$0xff]  ;;  %v1057_v12 = vld [vmem:[#allocation2 + $0x10] sm:$0xff]  ;;  %v795_v16 = vld [vmem:[#allocation7 + $0x28] sm:$0xff] }
  0x13   :  { %201 = vmatpush.bf16.msra.mxu0 %v788_v1  ;;  %799 = vmatpush.bf16.msra.mxu3 %v788_v1  ;;  %v1060_v13 = vld [vmem:[#allocation2 + $0x18] sm:$0xff]  ;;  %v796_v15 = vld [vmem:[#allocation7 + $0x30] sm:$0xff]  ;;  %v794_v17 = vld [vmem:[#allocation7 + $0x20] sm:$0xff] }
  0x14   :  { %v797_v14 = vld [vmem:[#allocation7 + $0x38] sm:$0xff]  ;;  %v1063_v18 = vld [vmem:[#allocation2 + $0x20] sm:$0xff]  ;;  %v1066_v19 = vld [vmem:[#allocation2 + $0x28] sm:$0xff] }
  0x15   :  { %337 = vmatpush.bf16.msra.mxu1 %v797_v14  ;;  %v793_v20 = vld [vmem:[#allocation7 + $0x18] sm:$0xff]  ;;  %v792_v21 = vld [vmem:[#allocation7 + $0x10] sm:$0xff]  ;;  %v791_v22 = vld [vmem:[#allocation7 + $0x8] sm:$0xff] }
  0x16   :  { %v790_v23 = vld [vmem:[#allocation7] sm:$0xff] }
  0x17   :  { %202 = vmatpush.bf16.msra.mxu0 %v787_v2  ;;  %800 = vmatpush.bf16.msra.mxu3 %v787_v2  ;;  %v830_v25 = vld [vmem:[%s1301_s2] ss:$0 sm:$0xff] }
  0x19   :  { %338 = vmatpush.bf16.msra.mxu1 %v796_v15 }
  0x1b   :  { %203 = vmatpush.bf16.msra.mxu0 %v786_v3  ;;  %801 = vmatpush.bf16.msra.mxu3 %v786_v3 }
  0x1d   :  { %339 = vmatpush.bf16.msra.mxu1 %v795_v16 }
  0x1f   :  { %204 = vmatpush.bf16.msra.mxu0 %v785_v4  ;;  %802 = vmatpush.bf16.msra.mxu3 %v785_v4 }
  0x21   :  { %340 = vmatpush.bf16.msra.mxu1 %v794_v17 }
  0x23   :  { %205 = vmatpush.bf16.msra.mxu0 %v784_v5  ;;  %803 = vmatpush.bf16.msra.mxu3 %v784_v5 }
  0x25   :  { %341 = vmatpush.bf16.msra.mxu1 %v793_v20 }
  0x27   :  { %206 = vmatpush.bf16.msra.mxu0 %v783_v6  ;;  %804 = vmatpush.bf16.msra.mxu3 %v783_v6 }
  0x29   :  { %342 = vmatpush.bf16.msra.mxu1 %v792_v21 }
  0x2b   :  { %207 = vmatpush.bf16.msra.mxu0 %v782_v7  ;;  %805 = vmatpush.bf16.msra.mxu3 %v782_v7 }
  0x2d   :  { %343 = vmatpush.bf16.msra.mxu1 %v791_v22 }
  0x2e   :  { %208 = vmatmul.bf16.vlgmr.msra.gmra.mxu0 %v1045_v8  ;;  %238 = vmatmul.bf16.vlgmr.msra.gmra.mxu3 %v1047_v9 }
  0x2f   :  { %806 = vmatpush.bf16.msrb.mxu3 %v797_v14 }
  0x31   :  { %344 = vmatpush.bf16.msra.mxu1 %v790_v23 }
  0x33   :  { %807 = vmatpush.bf16.msrb.mxu3 %v796_v15 }
  0x37   :  { %808 = vmatpush.bf16.msrb.mxu3 %v795_v16 }
  0x3b   :  { %809 = vmatpush.bf16.msrb.mxu3 %v794_v17 }
  0x3e   :  { %213 = vmatmul.bf16.gmra.mxu0 %v1051_v10  ;;  %243 = vmatmul.bf16.gmra.mxu3 %v1053_v11 }
  0x3f   :  { %810 = vmatpush.bf16.msrb.mxu3 %v793_v20 }
  0x43   :  { %811 = vmatpush.bf16.msrb.mxu3 %v792_v21 }
  0x47   :  { %812 = vmatpush.bf16.msrb.mxu3 %v791_v22 }
  0x4b   :  { %813 = vmatpush.bf16.msrb.mxu3 %v790_v23 }
  0x4e   :  { %218 = vmatmul.bf16.gmra.mxu0 %v1057_v12 }
  0x5e   :  { %223 = vmatmul.bf16.gmra.mxu0 %v1060_v13 }
  0x6e   :  { %228 = vmatmul.bf16.gmra.mxu0 %v1063_v18 }
  0x7e   :  { %233 = vmatmul.bf16.gmra.mxu0 %v1066_v19 }
  0xab   :  { %v209_v24 = vpop.f32.mrf.mxu0 }
  0xac   :  { %v210_v27 = vadd.f32 %v830_v25, %v209_v24 }
  0xae   :  { %v249_v30 = vmax.f32 %v210_v27, 0.0 }
  0xb1   :  { %v239_v26 = vpop.f32.mrf.mxu3 }
  0xb2   :  { %v240_v32 = vadd.f32 %v830_v25, %v239_v26 }
  0xb3   :  { %v211_v28 = vpop.f32.mrf.mxu0 }
  0xb4   :  { %v212_v29 = vadd.f32 %v830_v25, %v211_v28  ;;  %v261_v35 = vmax.f32 %v240_v32, 0.0 }
  0xb6   :  { %v250_v31 = vmax.f32 %v212_v29, 0.0 }
  0xb8   :  { %v265_v33 = vpack.c.bf16 %v250_v31, %v249_v30 }
  0xb9   :  { %v241_v34 = vpop.f32.mrf.mxu3 }
  0xba   :  { %345 = vmatmul.bf16.vlgmr.msra.gmra.mxu1 %v265_v33  ;;  %v242_v36 = vadd.f32 %v830_v25, %v241_v34 }
  0xbb   :  { %v214_v37 = vpop.f32.mrf.mxu0 }
  0xbc   :  { %v262_v38 = vmax.f32 %v242_v36, 0.0  ;;  %v215_v41 = vadd.f32 %v830_v25, %v214_v37 }
  0xbe   :  { %v271_v39 = vpack.c.bf16 %v262_v38, %v261_v35  ;;  %v251_v44 = vmax.f32 %v215_v41, 0.0 }
  0xc0   :  { %375 = vmatmul.bf16.vlgmr.msrb.gmra.mxu3 %v271_v39 }
  0xc1   :  { %v244_v40 = vpop.f32.mrf.mxu3 }
  0xc2   :  { %v245_v46 = vadd.f32 %v830_v25, %v244_v40 }
  0xc3   :  { %v216_v42 = vpop.f32.mrf.mxu0 }
  0xc4   :  { %v217_v43 = vadd.f32 %v830_v25, %v216_v42  ;;  %v263_v49 = vmax.f32 %v245_v46, 0.0 }
  0xc6   :  { %v252_v45 = vmax.f32 %v217_v43, 0.0 }
  0xc8   :  { %v266_v47 = vpack.c.bf16 %v252_v45, %v251_v44 }
  0xc9   :  { %v246_v48 = vpop.f32.mrf.mxu3 }
  0xca   :  { %350 = vmatmul.bf16.gmra.mxu1 %v266_v47  ;;  %v247_v50 = vadd.f32 %v830_v25, %v246_v48 }
  0xcb   :  { %v219_v51 = vpop.f32.mrf.mxu0 }
  0xcc   :  { %v264_v52 = vmax.f32 %v247_v50, 0.0  ;;  %v220_v54 = vadd.f32 %v830_v25, %v219_v51 }
  0xce   :  { %v272_v53 = vpack.c.bf16 %v264_v52, %v263_v49  ;;  %v253_v57 = vmax.f32 %v220_v54, 0.0  ;;  %v447_v49 = vlaneseq }
  0xd0   :  { %380 = vmatmul.bf16.gmra.mxu3 %v272_v53  ;;  %v1080_v50 = vand.u32 127, %v447_v49 }
  0xd2   :  { %vm449_vm0 = vcmp.lt.s32.totalorder %v1080_v50, 4 }
  0xd3   :  { %v221_v55 = vpop.f32.mrf.mxu0 }
  0xd4   :  { %v222_v56 = vadd.f32 %v830_v25, %v221_v55 }
  0xd6   :  { %v254_v58 = vmax.f32 %v222_v56, 0.0 }
  0xd8   :  { %v267_v59 = vpack.c.bf16 %v254_v58, %v253_v57 }
  0xda   :  { %355 = vmatmul.bf16.gmra.mxu1 %v267_v59 }
  0xdb   :  { %v224_v60 = vpop.f32.mrf.mxu0 }
  0xdc   :  { %v225_v61 = vadd.f32 %v830_v25, %v224_v60 }
  0xde   :  { %v255_v0 = vmax.f32 %v225_v61, 0.0 }
  0xe3   :  { %v226_v62 = vpop.f32.mrf.mxu0 }
  0xe4   :  { %v227_v63 = vadd.f32 %v830_v25, %v226_v62 }
  0xe6   :  { %v256_v1 = vmax.f32 %v227_v63, 0.0 }
  0xe8   :  { %v268_v2 = vpack.c.bf16 %v256_v1, %v255_v0 }
  0xea   :  { %360 = vmatmul.bf16.gmra.mxu1 %v268_v2 }
  0xeb   :  { %v229_v3 = vpop.f32.mrf.mxu0 }
  0xec   :  { %v230_v4 = vadd.f32 %v830_v25, %v229_v3 }
  0xee   :  { %v257_v7 = vmax.f32 %v230_v4, 0.0 }
  0xf3   :  { %v231_v5 = vpop.f32.mrf.mxu0 }
  0xf4   :  { %v232_v6 = vadd.f32 %v830_v25, %v231_v5 }
  0xf6   :  { %v258_v14 = vmax.f32 %v232_v6, 0.0 }
  0xf8   :  { %v269_v15 = vpack.c.bf16 %v258_v14, %v257_v7 }
  0xfa   :  { %365 = vmatmul.bf16.gmra.mxu1 %v269_v15 }
  0xfb   :  { %v234_v16 = vpop.f32.mrf.mxu0 }
  0xfc   :  { %v235_v17 = vadd.f32 %v830_v25, %v234_v16 }
  0xfe   :  { %v259_v22 = vmax.f32 %v235_v17, 0.0 }
 0x103   :  { %v236_v20 = vpop.f32.mrf.mxu0 }
 0x104   :  { %v237_v21 = vadd.f32 %v830_v25, %v236_v20 }
 0x106   :  { %v260_v23 = vmax.f32 %v237_v21, 0.0 }
 0x108   :  { %v270_v24 = vpack.c.bf16 %v260_v23, %v259_v22 }
 0x10a   :  { %370 = vmatmul.bf16.gmra.mxu1 %v270_v24 }
 0x137   :  { %v346_v26 = vpop.f32.mrf.mxu1 }
 0x13f   :  { %v348_v27 = vpop.f32.mrf.mxu1 }
 0x140   :  { %v386_v28 = vpack.c.bf16 %v348_v27, %v346_v26 }
 0x143   :  { %v376_v29 = vpop.f32.mrf.mxu3 }
 0x147   :  { %v351_v30 = vpop.f32.mrf.mxu1 }
 0x14b   :  { %v378_v31 = vpop.f32.mrf.mxu3 }
 0x14c   :  { %v392_v38 = vpack.c.bf16 %v378_v31, %v376_v29 }
 0x14f   :  { %v353_v32 = vpop.f32.mrf.mxu1 }
 0x150   :  { %v387_v33 = vpack.c.bf16 %v353_v32, %v351_v30 }
 0x153   :  { %v381_v34 = vpop.f32.mrf.mxu3 }
 0x157   :  { %v356_v35 = vpop.f32.mrf.mxu1 }
 0x15b   :  { %v383_v36 = vpop.f32.mrf.mxu3 }
 0x15c   :  { %v393_v37 = vpack.c.bf16 %v383_v36, %v381_v34 }
 0x15e   :  { %398 = vmatpush.bf16.msra.mxu2 %v393_v37  ;;  %814 = vmatpush.bf16.msra.mxu3 %v393_v37 }
 0x15f   :  { %v358_v25 = vpop.f32.mrf.mxu1 }
 0x160   :  { %v388_v48 = vpack.c.bf16 %v358_v25, %v356_v35 }
 0x162   :  { %399 = vmatpush.bf16.msra.mxu2 %v392_v38  ;;  %815 = vmatpush.bf16.msra.mxu3 %v392_v38 }
 0x167   :  { %v361_v39 = vpop.f32.mrf.mxu1 }
 0x16f   :  { %v363_v40 = vpop.f32.mrf.mxu1 }
 0x170   :  { %v389_v47 = vpack.c.bf16 %v363_v40, %v361_v39 }
 0x177   :  { %v366_v41 = vpop.f32.mrf.mxu1 }
 0x17f   :  { %v368_v42 = vpop.f32.mrf.mxu1 }
 0x180   :  { %v390_v46 = vpack.c.bf16 %v368_v42, %v366_v41 }
 0x187   :  { %v371_v43 = vpop.f32.mrf.mxu1 }
 0x18f   :  { %v373_v44 = vpop.f32.mrf.mxu1 }
 0x190   :  { %v391_v45 = vpack.c.bf16 %v373_v44, %v371_v43 }
 0x192   :  { %400 = vmatpush.bf16.msra.mxu2 %v391_v45  ;;  %816 = vmatpush.bf16.msra.mxu3 %v391_v45 }
 0x196   :  { %401 = vmatpush.bf16.msra.mxu2 %v390_v46  ;;  %817 = vmatpush.bf16.msra.mxu3 %v390_v46 }
 0x19a   :  { %402 = vmatpush.bf16.msra.mxu2 %v389_v47  ;;  %818 = vmatpush.bf16.msra.mxu3 %v389_v47 }
 0x19e   :  { %403 = vmatpush.bf16.msra.mxu2 %v388_v48  ;;  %819 = vmatpush.bf16.msra.mxu3 %v388_v48 }
 0x1a2   :  { %404 = vmatpush.bf16.msra.mxu2 %v387_v33  ;;  %820 = vmatpush.bf16.msra.mxu3 %v387_v33 }
 0x1a6   :  { %405 = vmatpush.bf16.msra.mxu2 %v386_v28  ;;  %821 = vmatpush.bf16.msra.mxu3 %v386_v28 }
 0x1a9   :  { %406 = vmatmul.bf16.vlgmr.msra.gmra.mxu2 %v1045_v8  ;;  %436 = vmatmul.bf16.vlgmr.msra.gmra.mxu3 %v1047_v9  ;;  %v1085_v8 = vld [vmem:[%s1303_s4] ss:$0 sm:$0xff]  ;;  %s1003_s4 = smov [#allocation8]  }
 0x1aa   :  { %s662_s10 = sshll.u32 %s1003_s4, 4  ;;  %s663_s10 = int_to_ptr.vmem [resolvable:$true] %s662_s10 }
 0x1b9   :  { %411 = vmatmul.bf16.gmra.mxu2 %v1051_v10  ;;  %441 = vmatmul.bf16.gmra.mxu3 %v1053_v11 }
 0x1c9   :  { %416 = vmatmul.bf16.gmra.mxu2 %v1057_v12 }
 0x1d9   :  { %421 = vmatmul.bf16.gmra.mxu2 %v1060_v13 }
 0x1e9   :  { %426 = vmatmul.bf16.gmra.mxu2 %v1063_v18 }
 0x1f9   :  { %431 = vmatmul.bf16.gmra.mxu2 %v1066_v19 }
 0x22c   :  { %v407_v9 = vpop.f32.mrf.mxu2  ;;  %v437_v11 = vpop.f32.mrf.mxu3 }
 0x22d   :  { %v1089_v10 = vadd.f32 %v1085_v8, %v407_v9  ;;  %v1095_v13 = vadd.f32 %v1085_v8, %v437_v11 }
 0x22f   :  { %v450_v12 = vsel %vm449_vm0, %v1089_v10, -inf  ;;  %v462_v19 = vsel %vm449_vm0, %v1095_v13, -inf }
 0x230   :  { %466 = vmax.xlane.f32.xlu0 %v450_v12 }
 0x234   :  { %v409_v18 = vpop.f32.mrf.mxu2  ;;  %v439_v5 = vpop.f32.mrf.mxu3 }
 0x235   :  { %v1101_v51 = vadd.f32 %v1085_v8, %v409_v18  ;;  %v1167_v30 = vadd.f32 %v1085_v8, %v439_v5 }
 0x237   :  { %v451_v55 = vsel %vm449_vm0, %v1101_v51, -inf  ;;  %v463_v34 = vsel %vm449_vm0, %v1167_v30, -inf }
 0x238   :  { %490 = vmax.xlane.f32.xlu0 %v462_v19 }
 0x23c   :  { %v412_v52 = vpop.f32.mrf.mxu2  ;;  %v442_v15 = vpop.f32.mrf.mxu3 }
 0x23d   :  { %v1104_v53 = vadd.f32 %v1085_v8, %v412_v52  ;;  %v1179_v35 = vadd.f32 %v1085_v8, %v442_v15 }
 0x23f   :  { %v452_v54 = vsel %vm449_vm0, %v1104_v53, -inf  ;;  %v464_v36 = vsel %vm449_vm0, %v1179_v35, -inf }
 0x240   :  { %470 = vmax.xlane.f32.xlu1 %v452_v54  ;;  %468 = vmax.xlane.f32.xlu0 %v451_v55 }
 0x244   :  { %v414_v56 = vpop.f32.mrf.mxu2  ;;  %v444_v22 = vpop.f32.mrf.mxu3 }
 0x245   :  { %v1113_v57 = vadd.f32 %v1085_v8, %v414_v56  ;;  %v1155_v24 = vadd.f32 %v1085_v8, %v444_v22 }
 0x247   :  { %v453_v58 = vsel %vm449_vm0, %v1113_v57, -inf  ;;  %v465_v28 = vsel %vm449_vm0, %v1155_v24, -inf }
 0x248   :  { %472 = vmax.xlane.f32.xlu1 %v453_v58 }
 0x24c   :  { %v417_v59 = vpop.f32.mrf.mxu2 }
 0x24d   :  { %v1119_v60 = vadd.f32 %v1085_v8, %v417_v59 }
 0x24f   :  { %v454_v61 = vsel %vm449_vm0, %v1119_v60, -inf }
 0x250   :  { %474 = vmax.xlane.f32.xlu2 %v454_v61 }
 0x254   :  { %v419_v62 = vpop.f32.mrf.mxu2 }
 0x255   :  { %v1125_v63 = vadd.f32 %v1085_v8, %v419_v62 }
 0x257   :  { %v455_v0 = vsel %vm449_vm0, %v1125_v63, -inf }
 0x258   :  { %476 = vmax.xlane.f32.xlu2 %v455_v0 }
 0x25c   :  { %v422_v1 = vpop.f32.mrf.mxu2 }
 0x25d   :  { %v1131_v2 = vadd.f32 %v1085_v8, %v422_v1 }
 0x25f   :  { %v456_v3 = vsel %vm449_vm0, %v1131_v2, -inf }
 0x260   :  { %478 = vmax.xlane.f32.xlu0 %v456_v3 }
 0x264   :  { %v424_v4 = vpop.f32.mrf.mxu2 }
 0x265   :  { %v1137_v6 = vadd.f32 %v1085_v8, %v424_v4 }
 0x267   :  { %v457_v7 = vsel %vm449_vm0, %v1137_v6, -inf }
 0x268   :  { %480 = vmax.xlane.f32.xlu1 %v457_v7 }
 0x26c   :  { %v427_v14 = vpop.f32.mrf.mxu2 }
 0x26d   :  { %v1143_v16 = vadd.f32 %v1085_v8, %v427_v14 }
 0x26f   :  { %v458_v17 = vsel %vm449_vm0, %v1143_v16, -inf }
 0x270   :  { %482 = vmax.xlane.f32.xlu2 %v458_v17 }
 0x274   :  { %v429_v20 = vpop.f32.mrf.mxu2 }
 0x275   :  { %v1149_v21 = vadd.f32 %v1085_v8, %v429_v20 }
 0x277   :  { %v459_v23 = vsel %vm449_vm0, %v1149_v21, -inf }
 0x278   :  { %484 = vmax.xlane.f32.xlu0 %v459_v23 }
 0x27c   :  { %v432_v26 = vpop.f32.mrf.mxu2 }
 0x27d   :  { %v1158_v27 = vadd.f32 %v1085_v8, %v432_v26 }
 0x27f   :  { %v460_v29 = vsel %vm449_vm0, %v1158_v27, -inf }
 0x280   :  { %486 = vmax.xlane.f32.xlu1 %v460_v29  ;;  %496 = vmax.xlane.f32.xlu0 %v465_v28 }
 0x284   :  { %v434_v31 = vpop.f32.mrf.mxu2 }
 0x285   :  { %v1170_v32 = vadd.f32 %v1085_v8, %v434_v31 }
 0x287   :  { %v461_v33 = vsel %vm449_vm0, %v1170_v32, -inf }
 0x288   :  { %488 = vmax.xlane.f32.xlu2 %v461_v33  ;;  %492 = vmax.xlane.f32.xlu1 %v463_v34 }
 0x290   :  { %494 = vmax.xlane.f32.xlu2 %v464_v36 }
 0x2a3   :  { %v467_v37 = vpop.xlane.xlu0 %466 }
 0x2a4   :  { %v1185_v38 = vsub.f32 %v1089_v10, %v467_v37 }
 0x2a6   :  { %v514_v25 = vmul.f32 1.442695, %v1185_v38 }
 0x2a8   :  { %832 = vpow2.f32 %v514_v25 }
 0x2ab   :  { %v491_v39 = vpop.xlane.xlu0 %490 }
 0x2ac   :  { %v1189_v40 = vsub.f32 %v1095_v13, %v491_v39 }
 0x2ae   :  { %v833_v41 = vpop.eup %832  ;;  %v538_v42 = vmul.f32 1.442695, %v1189_v40 }
 0x2af   :  { %v546_v43 = vsel %vm449_vm0, %v833_v41, 0.0 }
 0x2b0   :  { %834 = vpow2.f32 %v538_v42  ;;  %562 = vadd.xlane.f32.xlu1 %v546_v43 }
 0x2b3   :  { %v471_v44 = vpop.xlane.xlu1 %470  ;;  %v469_v45 = vpop.xlane.xlu0 %468 }
 0x2b4   :  { %v1195_v46 = vsub.f32 %v1104_v53, %v471_v44  ;;  %v1198_v47 = vsub.f32 %v1101_v51, %v469_v45 }
 0x2b6   :  { %v835_v48 = vpop.eup %834  ;;  %v518_v49 = vmul.f32 1.442695, %v1195_v46  ;;  %v516_v8 = vmul.f32 1.442695, %v1198_v47 }
 0x2b7   :  { %v558_v9 = vsel %vm449_vm0, %v835_v48, 0.0 }
 0x2b8   :  { %836 = vpow2.f32 %v518_v49  ;;  %586 = vadd.xlane.f32.xlu1 %v558_v9 }
 0x2b9   :  { %838 = vpow2.f32 %v516_v8 }
 0x2bb   :  { %v473_v10 = vpop.xlane.xlu1 %472 }
 0x2bc   :  { %v1205_v11 = vsub.f32 %v1113_v57, %v473_v10 }
 0x2be   :  { %v837_v12 = vpop.eup %836  ;;  %v520_v13 = vmul.f32 1.442695, %v1205_v11 }
 0x2bf   :  { %v839_v18 = vpop.eup %838  ;;  %v548_v19 = vsel %vm449_vm0, %v837_v12, 0.0 }
 0x2c0   :  { %840 = vpow2.f32 %v520_v13  ;;  %566 = vadd.xlane.f32.xlu0 %v548_v19  ;;  %v547_v51 = vsel %vm449_vm0, %v839_v18, 0.0 }
 0x2c1   :  { %564 = vadd.xlane.f32.xlu2 %v547_v51 }
 0x2c3   :  { %v475_v52 = vpop.xlane.xlu2 %474 }
 0x2c4   :  { %v1213_v53 = vsub.f32 %v1119_v60, %v475_v52 }
 0x2c6   :  { %v841_v54 = vpop.eup %840  ;;  %v522_v55 = vmul.f32 1.442695, %v1213_v53 }
 0x2c7   :  { %v549_v56 = vsel %vm449_vm0, %v841_v54, 0.0 }
 0x2c8   :  { %842 = vpow2.f32 %v522_v55  ;;  %568 = vadd.xlane.f32.xlu1 %v549_v56 }
 0x2cb   :  { %v477_v57 = vpop.xlane.xlu2 %476 }
 0x2cc   :  { %v1219_v58 = vsub.f32 %v1125_v63, %v477_v57 }
 0x2ce   :  { %v843_v59 = vpop.eup %842  ;;  %v524_v61 = vmul.f32 1.442695, %v1219_v58 }
 0x2cf   :  { %v550_v62 = vsel %vm449_vm0, %v843_v59, 0.0 }
 0x2d0   :  { %844 = vpow2.f32 %v524_v61  ;;  %570 = vadd.xlane.f32.xlu2 %v550_v62 }
 0x2d3   :  { %v479_v60 = vpop.xlane.xlu0 %478 }
 0x2d4   :  { %v1225_v0 = vsub.f32 %v1131_v2, %v479_v60 }
 0x2d6   :  { %v845_v1 = vpop.eup %844  ;;  %v526_v3 = vmul.f32 1.442695, %v1225_v0 }
 0x2d7   :  { %v551_v4 = vsel %vm449_vm0, %v845_v1, 0.0 }
 0x2d8   :  { %846 = vpow2.f32 %v526_v3  ;;  %572 = vadd.xlane.f32.xlu0 %v551_v4 }
 0x2db   :  { %v481_v63 = vpop.xlane.xlu1 %480 }
 0x2dc   :  { %v1231_v5 = vsub.f32 %v1137_v6, %v481_v63 }
 0x2de   :  { %v847_v7 = vpop.eup %846  ;;  %v528_v14 = vmul.f32 1.442695, %v1231_v5 }
 0x2df   :  { %v552_v15 = vsel %vm449_vm0, %v847_v7, 0.0 }
 0x2e0   :  { %848 = vpow2.f32 %v528_v14  ;;  %574 = vadd.xlane.f32.xlu1 %v552_v15 }
 0x2e3   :  { %v483_v2 = vpop.xlane.xlu2 %482 }
 0x2e4   :  { %v1237_v17 = vsub.f32 %v1143_v16, %v483_v2 }
 0x2e6   :  { %v849_v20 = vpop.eup %848  ;;  %v530_v22 = vmul.f32 1.442695, %v1237_v17 }
 0x2e7   :  { %v553_v23 = vsel %vm449_vm0, %v849_v20, 0.0 }
 0x2e8   :  { %850 = vpow2.f32 %v530_v22  ;;  %576 = vadd.xlane.f32.xlu2 %v553_v23 }
 0x2eb   :  { %v485_v6 = vpop.xlane.xlu0 %484 }
 0x2ec   :  { %v1243_v26 = vsub.f32 %v1149_v21, %v485_v6 }
 0x2ee   :  { %v851_v28 = vpop.eup %850  ;;  %v532_v29 = vmul.f32 1.442695, %v1243_v26 }
 0x2ef   :  { %v554_v31 = vsel %vm449_vm0, %v851_v28, 0.0 }
 0x2f0   :  { %852 = vpow2.f32 %v532_v29  ;;  %578 = vadd.xlane.f32.xlu0 %v554_v31 }
 0x2f3   :  { %v487_v16 = vpop.xlane.xlu1 %486  ;;  %v497_v33 = vpop.xlane.xlu0 %496 }
 0x2f4   :  { %v1249_v34 = vsub.f32 %v1158_v27, %v487_v16  ;;  %v1252_v36 = vsub.f32 %v1155_v24, %v497_v33 }
 0x2f6   :  { %v853_v37 = vpop.eup %852  ;;  %v534_v21 = vmul.f32 1.442695, %v1249_v34  ;;  %v544_v25 = vmul.f32 1.442695, %v1252_v36 }
 0x2f7   :  { %v555_v39 = vsel %vm449_vm0, %v853_v37, 0.0 }
 0x2f8   :  { %854 = vpow2.f32 %v534_v21  ;;  %580 = vadd.xlane.f32.xlu1 %v555_v39 }
 0x2f9   :  { %856 = vpow2.f32 %v544_v25 }
 0x2fb   :  { %v489_v41 = vpop.xlane.xlu2 %488  ;;  %v493_v42 = vpop.xlane.xlu1 %492 }
 0x2fc   :  { %v1259_v43 = vsub.f32 %v1170_v32, %v489_v41  ;;  %v1262_v27 = vsub.f32 %v1167_v30, %v493_v42 }
 0x2fe   :  { %v855_v24 = vpop.eup %854  ;;  %v536_v44 = vmul.f32 1.442695, %v1259_v43  ;;  %v540_v45 = vmul.f32 1.442695, %v1262_v27 }
 0x2ff   :  { %v857_v48 = vpop.eup %856  ;;  %v556_v49 = vsel %vm449_vm0, %v855_v24, 0.0 }
 0x300   :  { %858 = vpow2.f32 %v536_v44  ;;  %582 = vadd.xlane.f32.xlu2 %v556_v49  ;;  %v561_v8 = vsel %vm449_vm0, %v857_v48, 0.0 }
 0x301   :  { %860 = vpow2.f32 %v540_v45  ;;  %592 = vadd.xlane.f32.xlu1 %v561_v8 }
 0x303   :  { %v495_v32 = vpop.xlane.xlu2 %494 }
 0x304   :  { %v1271_v30 = vsub.f32 %v1179_v35, %v495_v32 }
 0x306   :  { %v859_v9 = vpop.eup %858  ;;  %v542_v10 = vmul.f32 1.442695, %v1271_v30 }
 0x307   :  { %v861_v12 = vpop.eup %860  ;;  %v557_v13 = vsel %vm449_vm0, %v859_v9, 0.0 }
 0x308   :  { %862 = vpow2.f32 %v542_v10  ;;  %584 = vadd.xlane.f32.xlu0 %v557_v13  ;;  %v559_v18 = vsel %vm449_vm0, %v861_v12, 0.0 }
 0x309   :  { %588 = vadd.xlane.f32.xlu2 %v559_v18 }
 0x30e   :  { %v863_v19 = vpop.eup %862 }
 0x30f   :  { %v560_v51 = vsel %vm449_vm0, %v863_v19, 0.0 }
 0x310   :  { %590 = vadd.xlane.f32.xlu0 %v560_v51 }
 0x323   :  { %v563_v35 = vpop.xlane.xlu1 %562 }
 0x324   :  { %864 = vlog2.f32 %v563_v35 }
 0x32a   :  { %v865_v52 = vpop.eup %864 }
 0x32b   :  { %v595_v54 = vmul.f32 0.6931472, %v865_v52  ;;  %v587_v55 = vpop.xlane.xlu1 %586 }
 0x32c   :  { %866 = vlog2.f32 %v587_v55 }
 0x32d   :  { %v626_v56 = vsub.f32 %v1185_v38, %v595_v54 }
 0x32f   :  { %642 = vst [vmem:[#allocation8] sm:$0xff] %v626_v56 }
 0x332   :  { %v867_v57 = vpop.eup %866 }
 0x333   :  { %v619_v59 = vmul.f32 0.6931472, %v867_v57  ;;  %v567_v61 = vpop.xlane.xlu0 %566 }
 0x334   :  { %v565_v62 = vpop.xlane.xlu2 %564  ;;  %868 = vlog2.f32 %v567_v61 }
 0x335   :  { %v638_v60 = vsub.f32 %v1189_v40, %v619_v59  ;;  %870 = vlog2.f32 %v565_v62 }
 0x337   :  { %654 = vst [vmem:[#allocation8 + $0x60] sm:$0xff] %v638_v60 }
 0x33a   :  { %v869_v50 = vpop.eup %868 }
 0x33b   :  { %v871_v1 = vpop.eup %870  ;;  %v599_v3 = vmul.f32 0.6931472, %v869_v50  ;;  %v569_v4 = vpop.xlane.xlu1 %568 }
 0x33c   :  { %v597_v63 = vmul.f32 0.6931472, %v871_v1  ;;  %872 = vlog2.f32 %v569_v4 }
 0x33d   :  { %v628_v7 = vsub.f32 %v1195_v46, %v599_v3 }
 0x33e   :  { %v627_v38 = vsub.f32 %v1198_v47, %v597_v63 }
 0x33f   :  { %644 = vst [vmem:[#allocation8 + $0x10] sm:$0xff] %v628_v7 }
 0x340   :  { %643 = vst [vmem:[#allocation8 + $0x8] sm:$0xff] %v627_v38 }
 0x342   :  { %v873_v14 = vpop.eup %872 }
 0x343   :  { %v601_v15 = vmul.f32 0.6931472, %v873_v14  ;;  %v571_v2 = vpop.xlane.xlu2 %570 }
 0x344   :  { %874 = vlog2.f32 %v571_v2 }
 0x345   :  { %v629_v40 = vsub.f32 %v1205_v11, %v601_v15 }
 0x347   :  { %645 = vst [vmem:[#allocation8 + $0x18] sm:$0xff] %v629_v40 }
 0x34a   :  { %v875_v20 = vpop.eup %874 }
 0x34b   :  { %v603_v22 = vmul.f32 0.6931472, %v875_v20  ;;  %v573_v23 = vpop.xlane.xlu0 %572 }
 0x34c   :  { %876 = vlog2.f32 %v573_v23 }
 0x34d   :  { %v630_v6 = vsub.f32 %v1213_v53, %v603_v22 }
 0x34f   :  { %646 = vst [vmem:[#allocation8 + $0x20] sm:$0xff] %v630_v6 }
 0x352   :  { %v877_v28 = vpop.eup %876 }
 0x353   :  { %v605_v46 = vmul.f32 0.6931472, %v877_v28  ;;  %v575_v29 = vpop.xlane.xlu1 %574 }
 0x354   :  { %878 = vlog2.f32 %v575_v29 }
 0x355   :  { %v631_v47 = vsub.f32 %v1219_v58, %v605_v46 }
 0x357   :  { %647 = vst [vmem:[#allocation8 + $0x28] sm:$0xff] %v631_v47 }
 0x35a   :  { %v879_v31 = vpop.eup %878 }
 0x35b   :  { %v607_v16 = vmul.f32 0.6931472, %v879_v31  ;;  %v577_v33 = vpop.xlane.xlu2 %576 }
 0x35c   :  { %880 = vlog2.f32 %v577_v33 }
 0x35d   :  { %v632_v11 = vsub.f32 %v1225_v0, %v607_v16 }
 0x35f   :  { %648 = vst [vmem:[#allocation8 + $0x30] sm:$0xff] %v632_v11 }
 0x362   :  { %v881_v37 = vpop.eup %880 }
 0x363   :  { %v609_v21 = vmul.f32 0.6931472, %v881_v37  ;;  %v579_v25 = vpop.xlane.xlu0 %578 }
 0x364   :  { %882 = vlog2.f32 %v579_v25 }
 0x365   :  { %v633_v53 = vsub.f32 %v1231_v5, %v609_v21 }
 0x367   :  { %649 = vst [vmem:[#allocation8 + $0x38] sm:$0xff] %v633_v53 }
 0x36a   :  { %v883_v39 = vpop.eup %882 }
 0x36b   :  { %v611_v41 = vmul.f32 0.6931472, %v883_v39  ;;  %v581_v42 = vpop.xlane.xlu1 %580 }
 0x36c   :  { %884 = vlog2.f32 %v581_v42 }
 0x36d   :  { %v634_v58 = vsub.f32 %v1237_v17, %v611_v41 }
 0x36f   :  { %650 = vst [vmem:[#allocation8 + $0x40] sm:$0xff] %v634_v58 }
 0x372   :  { %v885_v24 = vpop.eup %884 }
 0x373   :  { %v613_v44 = vmul.f32 0.6931472, %v885_v24  ;;  %v583_v45 = vpop.xlane.xlu2 %582 }
 0x374   :  { %886 = vlog2.f32 %v583_v45  ;;  %v593_v0 = vpop.xlane.xlu1 %592 }
 0x375   :  { %v635_v48 = vsub.f32 %v1243_v26, %v613_v44  ;;  %888 = vlog2.f32 %v593_v0 }
 0x377   :  { %651 = vst [vmem:[#allocation8 + $0x48] sm:$0xff] %v635_v48 }
 0x37a   :  { %v887_v49 = vpop.eup %886 }
 0x37b   :  { %v889_v8 = vpop.eup %888  ;;  %v615_v5 = vmul.f32 0.6931472, %v887_v49  ;;  %v585_v32 = vpop.xlane.xlu0 %584 }
 0x37c   :  { %v625_v9 = vmul.f32 0.6931472, %v889_v8  ;;  %v589_v10 = vpop.xlane.xlu2 %588  ;;  %890 = vlog2.f32 %v585_v32 }
 0x37d   :  { %v636_v12 = vsub.f32 %v1249_v34, %v615_v5  ;;  %892 = vlog2.f32 %v589_v10 }
 0x37e   :  { %v641_v17 = vsub.f32 %v1252_v36, %v625_v9 }
 0x37f   :  { %652 = vst [vmem:[#allocation8 + $0x50] sm:$0xff] %v636_v12 }
 0x380   :  { %657 = vst [vmem:[#allocation8 + $0x78] sm:$0xff] %v641_v17 }
 0x382   :  { %v891_v13 = vpop.eup %890 }
 0x383   :  { %v893_v18 = vpop.eup %892  ;;  %v617_v19 = vmul.f32 0.6931472, %v891_v13  ;;  %v591_v26 = vpop.xlane.xlu0 %590 }
 0x384   :  { %v621_v51 = vmul.f32 0.6931472, %v893_v18  ;;  %894 = vlog2.f32 %v591_v26 }
 0x385   :  { %v637_v35 = vsub.f32 %v1259_v43, %v617_v19 }
 0x386   :  { %v639_v52 = vsub.f32 %v1262_v27, %v621_v51 }
 0x387   :  { %653 = vst [vmem:[#allocation8 + $0x58] sm:$0xff] %v637_v35 }
 0x388   :  { %655 = vst [vmem:[#allocation8 + $0x68] sm:$0xff] %v639_v52 }
 0x38a   :  { %v895_v34 = vpop.eup %894 }
 0x38b   :  { %v623_v36 = vmul.f32 0.6931472, %v895_v34 }
 0x38d   :  { %v640_v54 = vsub.f32 %v1271_v30, %v623_v36 }
 0x38f   :  { %656 = vst [vmem:[#allocation8 + $0x70] sm:$0xff] %v640_v54 }
 0x390   :  { %670 = dma.vmem_to_hbm [thread:$0]  %s663_s10, 2048, %s665_s13, [#allocation4], %s1004_s14, %s1004_s14, %s1005_s15  }
 0x391   :  { %996 = dma.done.wait [#allocation4], 2048  }
 0x392   :  { %997 = vsyncadd [#allocation4], 4294965248 }
 0x393   :  { %675 = vsyncpa [#allocation3], 1 }
 0x394   :  { %676 = vsyncpa [#allocation6], 1 }
 0x395   :  { %677 = vsyncpa [#allocation4], 1 }

</bundles_post_ra>
